<compile_context>
chip_gen: v6e
topology: v6e:2x2x1
jax: 0.10.0
libtpu: 0.0.40
codegen_flags: <defaults>
</compile_context>

<pallas_src>
import functools

import jax
import jax.numpy as jnp
from jax.experimental import pallas as pl
from jax.experimental.pallas import tpu as pltpu

LANE = 128     # vreg lane width / MXU alignment target
SUBLANE = 8    # f32 sublane count


def _round_up(n, m):
    return ((n + m - 1) // m) * m


def _mlp_kernel(x_ref, w1_ref, b1_ref, w2_ref, b2_ref, w3_ref, b3_ref, o_ref):
    # x tile: (tile_b, d_in) in the caller's dtype; cast to the bf16 matmul
    # operand dtype in VMEM (no extra HBM round trip for a pre-cast x copy).
    cdt = w1_ref.dtype
    x = x_ref[...].astype(cdt)

    # fc1 + ReLU  (f32 MXU accumulation; bias-add / ReLU in f32)
    h = jnp.dot(x, w1_ref[...], preferred_element_type=jnp.float32) + b1_ref[...]
    h = jnp.maximum(h, 0.0)

    # fc2 + ReLU
    h = jnp.dot(h.astype(cdt), w2_ref[...],
                preferred_element_type=jnp.float32) + b2_ref[...]
    h = jnp.maximum(h, 0.0)

    # fc3 (logits), stored lane-dense in the (bf16) output slab dtype
    out = jnp.dot(h.astype(cdt), w3_ref[...],
                  preferred_element_type=jnp.float32) + b3_ref[...]
    o_ref[...] = out.astype(o_ref.dtype)


def prepare_params(params, compute_dtype=jnp.bfloat16):
    """One-time param prep (outside the hot path).

    Transposes PyTorch-layout (out,in) weights to (in,out), zero-pads *output*
    feature dims up to 128 (lane-dense matmuls / stores) and casts weights to the
    matmul operand dtype. The input (K) dim of w1 is left at input_size so the x
    stream is never padded. Biases stay f32 (elementwise path stays f32).
    Zero padding is numerically exact (padded columns contribute exactly 0).
    """
    d_in = params["w1"].shape[1]
    d_hid = params["w1"].shape[0]
    d_out = params["w3"].shape[0]
    d_hid_p = _round_up(d_hid, LANE)
    d_out_p = _round_up(d_out, LANE)

    def pad_w(w, rows, rows_p, cols_p):
        wt = jnp.asarray(w, compute_dtype).T  # (in, out)
        assert wt.shape[0] == rows
        return jnp.pad(wt, ((0, rows_p - wt.shape[0]), (0, cols_p - wt.shape[1])))

    def pad_b(b, cols_p):
        b = jnp.asarray(b, jnp.float32)
        return jnp.pad(b, (0, cols_p - b.shape[0]))[None, :]  # (1, cols_p), f32

    return {
        "w1": pad_w(params["w1"], d_in, d_in, d_hid_p),        # (d_in,    d_hid_p)
        "b1": pad_b(params["b1"], d_hid_p),
        "w2": pad_w(params["w2"], d_hid, d_hid_p, d_hid_p),    # (d_hid_p, d_hid_p)
        "b2": pad_b(params["b2"], d_hid_p),
        "w3": pad_w(params["w3"], d_hid, d_hid_p, d_out_p),    # (d_hid_p, d_out_p)
        "b3": pad_b(params["b3"], d_out_p),
    }


def _choose_tile_b(B):
    if B <= 2 * LANE:
        # Small batch: a single (or two) sublane-aligned tile(s).
        return _round_up(min(max(B, 1), LANE), SUBLANE)
    # Large batch: big tiles for HBM-roofline efficiency, capped so the grid has
    # >= 2 parallel steps (keeps v7x's second TensorCore busy).
    return min(1024, _round_up(pl.cdiv(B, 2), LANE))


def linear_classifier_forward(x, prep, *, num_classes):
    """Forward pass. `prep` = prepare_params(...); passed explicitly (no closure)."""
    B, d_in = x.shape
    w1, b1 = prep["w1"], prep["b1"]
    w2, b2 = prep["w2"], prep["b2"]
    w3, b3 = prep["w3"], prep["b3"]
    assert w1.shape[0] == d_in, "prep params do not match x feature dim"
    d_hid_p = w1.shape[1]
    d_out_p = w3.shape[1]
    out_dtype = w1.dtype  # bf16 slab -> half the writeback bytes

    tile_b = _choose_tile_b(B)
    grid = (pl.cdiv(B, tile_b),)  # partial last block is masked; rows independent

    flops = 2 * B * (d_in * d_hid_p + d_hid_p * d_hid_p + d_hid_p * d_out_p)
    bytes_accessed = int(
        x.dtype.itemsize * B * d_in
        + w1.dtype.itemsize * (d_in * d_hid_p + d_hid_p * d_hid_p + d_hid_p * d_out_p)
        + 4 * (2 * d_hid_p + d_out_p)
        + jnp.dtype(out_dtype).itemsize * B * d_out_p
    )

    out_p = pl.pallas_call(
        _mlp_kernel,
        out_shape=jax.ShapeDtypeStruct((B, d_out_p), out_dtype),
        grid=grid,
        in_specs=[
            # x: tiled over batch, full (unpadded) feature dim, double-buffered.
            pl.BlockSpec((tile_b, d_in), lambda i: (i, 0)),
            # weights / biases: constant index_map -> VMEM-resident across steps.
            pl.BlockSpec((d_in, d_hid_p), lambda i: (0, 0)),
            pl.BlockSpec((1, d_hid_p), lambda i: (0, 0)),
            pl.BlockSpec((d_hid_p, d_hid_p), lambda i: (0, 0)),
            pl.BlockSpec((1, d_hid_p), lambda i: (0, 0)),
            pl.BlockSpec((d_hid_p, d_out_p), lambda i: (0, 0)),
            pl.BlockSpec((1, d_out_p), lambda i: (0, 0)),
        ],
        out_specs=pl.BlockSpec((tile_b, d_out_p), lambda i: (i, 0)),
        compiler_params=pltpu.CompilerParams(
            dimension_semantics=("parallel",)),
        cost_estimate=pl.CostEstimate(
            flops=flops, transcendentals=0, bytes_accessed=bytes_accessed),
    )(x, w1, b1, w2, b2, w3, b3)

    # Tiny slice to the logical class columns; return f32 to match the module.
    return out_p[:, :num_classes].astype(jnp.float32)


def init_params(key, input_size, hidden_size, num_classes):
    """Deterministic init mirroring nn.Linear's default (uniform +/- 1/sqrt(fan_in))."""
    ks = jax.random.split(key, 6)

    def linear_init(kw, kb, fan_in, fan_out):
        bound = 1.0 / jnp.sqrt(jnp.float32(fan_in))
        w = jax.random.uniform(kw, (fan_out, fan_in), jnp.float32, -bound, bound)
        b = jax.random.uniform(kb, (fan_out,), jnp.float32, -bound, bound)
        return w, b

    w1, b1 = linear_init(ks[0], ks[1], input_size, hidden_size)
    w2, b2 = linear_init(ks[2], ks[3], hidden_size, hidden_size)
    w3, b3 = linear_init(ks[4], ks[5], hidden_size, num_classes)
    return {"w1": w1, "b1": b1, "w2": w2, "b2": b2, "w3": w3, "b3": b3}


if __name__ == "__main__":
    key = jax.random.PRNGKey(0)
    k_x, k_p = jax.random.split(key)

    batch = 8
    input_size = 32
    hidden_size = 32
    num_classes = 10

    x = jax.random.normal(k_x, (batch, input_size), jnp.float32)
    params = init_params(k_p, input_size, hidden_size, num_classes)

    # One-time prep; prepared params are explicit jit args (not trace constants).
    prep = prepare_params(params, compute_dtype=jnp.bfloat16)
    fwd = jax.jit(functools.partial(linear_classifier_forward,
                                    num_classes=num_classes))

    out = fwd(x, prep)
    jax.block_until_ready(out)

    # Sanity check against a pure-JAX f32 reference of the same forward pass.
    # bf16 matmul operands loosen agreement from 1e-5 to ~1e-2 relative.
    def relu(a):
        return jnp.maximum(a, 0.0)

    ref = relu(x @ params["w1"].T + params["b1"])
    ref = relu(ref @ params["w2"].T + params["b2"])
    ref = ref @ params["w3"].T + params["b3"]

    assert out.shape == (batch, num_classes)
    assert out.dtype == jnp.float32
    assert jnp.allclose(out, ref, atol=7.5e-2, rtol=7.5e-2), float(
        jnp.max(jnp.abs(out - ref)))

    print("KERNEL_OK")
</pallas_src>

<mosaic_0001>
module attributes {stable_mosaic.version = 11 : i64} {
  func.func @_mlp_kernel(%arg0: i32, %arg1: memref<8x32xf32, #tpu.memory_space<vmem>>, %arg2: memref<32x128xbf16, #tpu.memory_space<vmem>>, %arg3: memref<1x128xf32, #tpu.memory_space<vmem>>, %arg4: memref<128x128xbf16, #tpu.memory_space<vmem>>, %arg5: memref<1x128xf32, #tpu.memory_space<vmem>>, %arg6: memref<128x128xbf16, #tpu.memory_space<vmem>>, %arg7: memref<1x128xf32, #tpu.memory_space<vmem>>, %arg8: memref<8x128xbf16, #tpu.memory_space<vmem>>) attributes {dimension_semantics = [#tpu.dimension_semantics<parallel>], iteration_bounds = array<i64: 1>, scalar_prefetch = 0 : i64, scratch_operands = 0 : i64, tpu.core_type = #tpu.core_type<tc>, window_params = [{transform_indices = @transform_0, window_bounds = array<i64: 8, 32>}, {pipeline_mode = #tpu.pipeline_mode<synchronous>, transform_indices = @transform_1, window_bounds = array<i64: 32, 128>}, {pipeline_mode = #tpu.pipeline_mode<synchronous>, transform_indices = @transform_2, window_bounds = array<i64: 1, 128>}, {pipeline_mode = #tpu.pipeline_mode<synchronous>, transform_indices = @transform_3, window_bounds = array<i64: 128, 128>}, {pipeline_mode = #tpu.pipeline_mode<synchronous>, transform_indices = @transform_4, window_bounds = array<i64: 1, 128>}, {pipeline_mode = #tpu.pipeline_mode<synchronous>, transform_indices = @transform_5, window_bounds = array<i64: 128, 128>}, {pipeline_mode = #tpu.pipeline_mode<synchronous>, transform_indices = @transform_6, window_bounds = array<i64: 1, 128>}, {transform_indices = @transform_7, window_bounds = array<i64: 8, 128>}]} {
    %c0 = arith.constant 0 : index
    %c0_0 = arith.constant 0 : index
    %0 = vector.load %arg1[%c0, %c0_0] : memref<8x32xf32, #tpu.memory_space<vmem>>, vector<8x32xf32>
    %1 = arith.truncf %0 : vector<8x32xf32> to vector<8x32xbf16>
    %c0_1 = arith.constant 0 : index
    %c0_2 = arith.constant 0 : index
    %2 = vector.load %arg2[%c0_1, %c0_2] : memref<32x128xbf16, #tpu.memory_space<vmem>>, vector<32x128xbf16>
    %cst = arith.constant dense<0.000000e+00> : vector<8x128xf32>
    %3 = tpu.matmul %1, %2, %cst {dimension_numbers = #tpu.dot_dimension_numbers<[1], [0], [0], [1], [0, 0, 1, 1], [], []>} : vector<8x32xbf16>, vector<32x128xbf16>, vector<8x128xf32> -> vector<8x128xf32>
    %c0_3 = arith.constant 0 : index
    %c0_4 = arith.constant 0 : index
    %4 = vector.load %arg3[%c0_3, %c0_4] : memref<1x128xf32, #tpu.memory_space<vmem>>, vector<1x128xf32>
    %5 = vector.broadcast %4 : vector<1x128xf32> to vector<8x128xf32>
    %6 = arith.addf %3, %5 : vector<8x128xf32>
    %cst_5 = arith.constant 0.000000e+00 : f32
    %7 = vector.broadcast %cst_5 : f32 to vector<8x128xf32>
    %8 = arith.maximumf %6, %7 : vector<8x128xf32>
    %9 = arith.truncf %8 : vector<8x128xf32> to vector<8x128xbf16>
    %c0_6 = arith.constant 0 : index
    %c0_7 = arith.constant 0 : index
    %10 = vector.load %arg4[%c0_6, %c0_7] : memref<128x128xbf16, #tpu.memory_space<vmem>>, vector<128x128xbf16>
    %cst_8 = arith.constant dense<0.000000e+00> : vector<8x128xf32>
    %11 = tpu.matmul %9, %10, %cst_8 {dimension_numbers = #tpu.dot_dimension_numbers<[1], [0], [0], [1], [0, 0, 1, 1], [], []>} : vector<8x128xbf16>, vector<128x128xbf16>, vector<8x128xf32> -> vector<8x128xf32>
    %c0_9 = arith.constant 0 : index
    %c0_10 = arith.constant 0 : index
    %12 = vector.load %arg5[%c0_9, %c0_10] : memref<1x128xf32, #tpu.memory_space<vmem>>, vector<1x128xf32>
    %13 = vector.broadcast %12 : vector<1x128xf32> to vector<8x128xf32>
    %14 = arith.addf %11, %13 : vector<8x128xf32>
    %cst_11 = arith.constant 0.000000e+00 : f32
    %15 = vector.broadcast %cst_11 : f32 to vector<8x128xf32>
    %16 = arith.maximumf %14, %15 : vector<8x128xf32>
    %17 = arith.truncf %16 : vector<8x128xf32> to vector<8x128xbf16>
    %c0_12 = arith.constant 0 : index
    %c0_13 = arith.constant 0 : index
    %18 = vector.load %arg6[%c0_12, %c0_13] : memref<128x128xbf16, #tpu.memory_space<vmem>>, vector<128x128xbf16>
    %cst_14 = arith.constant dense<0.000000e+00> : vector<8x128xf32>
    %19 = tpu.matmul %17, %18, %cst_14 {dimension_numbers = #tpu.dot_dimension_numbers<[1], [0], [0], [1], [0, 0, 1, 1], [], []>} : vector<8x128xbf16>, vector<128x128xbf16>, vector<8x128xf32> -> vector<8x128xf32>
    %c0_15 = arith.constant 0 : index
    %c0_16 = arith.constant 0 : index
    %20 = vector.load %arg7[%c0_15, %c0_16] : memref<1x128xf32, #tpu.memory_space<vmem>>, vector<1x128xf32>
    %21 = vector.broadcast %20 : vector<1x128xf32> to vector<8x128xf32>
    %22 = arith.addf %19, %21 : vector<8x128xf32>
    %23 = arith.truncf %22 : vector<8x128xf32> to vector<8x128xbf16>
    %c0_17 = arith.constant 0 : index
    %c0_18 = arith.constant 0 : index
    %24 = vector.load %arg8[%c0_17, %c0_18] : memref<8x128xbf16, #tpu.memory_space<vmem>>, vector<8x128xbf16>
    tpu.vector_store %arg8[%c0_17, %c0_18], %23 {strides = array<i32>} : memref<8x128xbf16, #tpu.memory_space<vmem>>, vector<8x128xbf16>,
    return
  }
  func.func @transform_0(%arg0: i32) -> (i32, i32) {
    %c0_i32 = arith.constant 0 : i32
    %c0_i32_0 = arith.constant 0 : i32
    return %arg0, %c0_i32 : i32, i32
  }
  func.func @transform_1(%arg0: i32) -> (i32, i32) {
    %c0_i32 = arith.constant 0 : i32
    %c0_i32_0 = arith.constant 0 : i32
    %c0_i32_1 = arith.constant 0 : i32
    return %c0_i32, %c0_i32_0 : i32, i32
  }
  func.func @transform_2(%arg0: i32) -> (i32, i32) {
    %c0_i32 = arith.constant 0 : i32
    %c0_i32_0 = arith.constant 0 : i32
    %c0_i32_1 = arith.constant 0 : i32
    return %c0_i32, %c0_i32_0 : i32, i32
  }
  func.func @transform_3(%arg0: i32) -> (i32, i32) {
    %c0_i32 = arith.constant 0 : i32
    %c0_i32_0 = arith.constant 0 : i32
    %c0_i32_1 = arith.constant 0 : i32
    return %c0_i32, %c0_i32_0 : i32, i32
  }
  func.func @transform_4(%arg0: i32) -> (i32, i32) {
    %c0_i32 = arith.constant 0 : i32
    %c0_i32_0 = arith.constant 0 : i32
    %c0_i32_1 = arith.constant 0 : i32
    return %c0_i32, %c0_i32_0 : i32, i32
  }
  func.func @transform_5(%arg0: i32) -> (i32, i32) {
    %c0_i32 = arith.constant 0 : i32
    %c0_i32_0 = arith.constant 0 : i32
    %c0_i32_1 = arith.constant 0 : i32
    return %c0_i32, %c0_i32_0 : i32, i32
  }
  func.func @transform_6(%arg0: i32) -> (i32, i32) {
    %c0_i32 = arith.constant 0 : i32
    %c0_i32_0 = arith.constant 0 : i32
    %c0_i32_1 = arith.constant 0 : i32
    return %c0_i32, %c0_i32_0 : i32, i32
  }
  func.func @transform_7(%arg0: i32) -> (i32, i32) {
    %c0_i32 = arith.constant 0 : i32
    %c0_i32_0 = arith.constant 0 : i32
    return %arg0, %c0_i32 : i32, i32
  }
}

</mosaic_0001>

<bundles_post_ra>
// kernel: linear_classifier_forward.1
= control target key start
LH: loop header
LB: loop body
LE: loop exit
PB: predicated region body
PF: predicated region fallthrough
CT: control target
= control target key end

     0   :  { %12 = vsyncpa [#allocation3], 0  ;;  %s692_s0 = inlined_call_operand.hbm [shape: f32[8,32], index: 0, kind: input, shape index: {}]   ;;  %s693_s1 = inlined_call_operand.hbm [shape: bf16[32,128], index: 1, kind: input, shape index: {}]   ;;  %s694_s2 = inlined_call_operand.vmem [shape: f32[1,128], index: 2, kind: input, shape index: {}]   ;;  %s695_s3 = inlined_call_operand.hbm [shape: bf16[128,128], index: 3, kind: input, shape index: {}]   ;;  %s696_s4 = inlined_call_operand.vmem [shape: f32[1,128], index: 4, kind: input, shape index: {}]   ;;  %s697_s5 = inlined_call_operand.hbm [shape: bf16[128,128], index: 5, kind: input, shape index: {}]   ;;  %s698_s6 = inlined_call_operand.vmem [shape: f32[1,128], index: 6, kind: input, shape index: {}]   ;;  %s699_s7 = inlined_call_operand.vmem [shape: bf16[8,128], index: 7, kind: output, shape index: {}]  }
   0x1   :  { %13 = vsyncpa [#allocation5], 0 }
   0x2   :  { %14 = vsyncpa [#allocation8], 0  ;;  %s587_s24 = smov [#allocation4]  }
   0x3   :  { %s30_s25 = sshll.u32 %s587_s24, 4  ;;  %s31_s25 = int_to_ptr.vmem [resolvable:$true] %s30_s25 }
   0x4   :  { %s509_s26 = scalar_lea.vmem %s31_s25, 256  ;;  %p514_p1 = scmp.lt.s32.totalorder %s31_s25, %s31_s25 }
   0x5   :  { %p510_p0 = scmp.ne.s32.totalorder %s31_s25, %s509_s26  ;;  %p515_p2 = scmp.lt.s32.totalorder %s509_s26, %s509_s26 }
   0x7   :  { %p516_p3 = por %p515_p2, %p514_p1 }
   0x9   :  { %p517_p4 = pnand %p516_p3, %p510_p0 }
   0xb   :  { %520 = shalt.err (!%p517_p4)
}
   0xc   :  { %s588_s27 = smov 64   ;;  %s589_s28 = smov 4  }
   0xd   :  { %36 = dma.hbm_to_vmem [thread:$0]  %s693_s1, 256, %s31_s25, [#allocation5], %s588_s27, %s588_s27, %s589_s28  }
   0xe   :  { %s590_s8 = smov [#allocation2]   ;;  %s591_s10 = smov [#allocation6]  }
   0xf   :  { %s21_s9 = sshll.u32 %s590_s8, 4  ;;  %s44_s11 = sshll.u32 %s591_s10, 4  ;;  %s22_s9 = int_to_ptr.vmem [resolvable:$true] %s21_s9  ;;  %s45_s11 = int_to_ptr.vmem [resolvable:$true] %s44_s11 }
  0x10   :  { %s529_s12 = scalar_lea.vmem %s22_s9, 128  ;;  %p534_p6 = scmp.lt.s32.totalorder %s22_s9, %s22_s9 }
  0x11   :  { %p530_p5 = scmp.ne.s32.totalorder %s22_s9, %s529_s12  ;;  %p535_p7 = scmp.lt.s32.totalorder %s529_s12, %s529_s12 }
  0x13   :  { %p536_p8 = por %p535_p7, %p534_p6 }
  0x15   :  { %p537_p9 = pnand %p536_p8, %p530_p5 }
  0x17   :  { %540 = shalt.err (!%p537_p9)
}
  0x18   :  { %24 = dma.hbm_to_vmem [thread:$0]  %s692_s0, 128, %s22_s9, [#allocation3]  }
  0x19   :  { %s549_s15 = scalar_lea.vmem %s45_s11, 1024  ;;  %p554_p11 = scmp.lt.s32.totalorder %s45_s11, %s45_s11 }
  0x1a   :  { %p550_p10 = scmp.ne.s32.totalorder %s45_s11, %s549_s15  ;;  %p555_p12 = scmp.lt.s32.totalorder %s549_s15, %s549_s15 }
  0x1c   :  { %p556_p13 = por %p555_p12, %p554_p11 }
  0x1e   :  { %p557_p0 = pnand %p556_p13, %p550_p10 }
  0x20   :  { %560 = shalt.err (!%p557_p0)
}
  0x21   :  { %50 = dma.hbm_to_vmem [thread:$0]  %s695_s3, 1024, %s45_s11, [#allocation5], %s588_s27, %s588_s27, %s589_s28  }
  0x22   :  { %s592_s17 = smov [#allocation7]  }
  0x23   :  { %s58_s18 = sshll.u32 %s592_s17, 4  ;;  %s59_s18 = int_to_ptr.vmem [resolvable:$true] %s58_s18 }
  0x24   :  { %s569_s19 = scalar_lea.vmem %s59_s18, 1024  ;;  %p574_p2 = scmp.lt.s32.totalorder %s59_s18, %s59_s18 }
  0x25   :  { %p570_p1 = scmp.ne.s32.totalorder %s59_s18, %s569_s19  ;;  %p575_p3 = scmp.lt.s32.totalorder %s569_s19, %s569_s19 }
  0x27   :  { %p576_p4 = por %p575_p3, %p574_p2 }
  0x29   :  { %p577_p5 = pnand %p576_p4, %p570_p1 }
  0x2b   :  { %580 = shalt.err (!%p577_p5)
}
  0x2c   :  { %64 = dma.hbm_to_vmem [thread:$0]  %s697_s5, 1024, %s59_s18, [#allocation8], %s588_s27, %s588_s27, %s589_s28  }
  0x2d   :  { %581 = dma.done.wait [#allocation3], 128  }
  0x2e   :  { %582 = vsyncadd [#allocation3], 4294967168 }
  0x2f   :  { %583 = dma.done.wait [#allocation5], 1280  }
  0x30   :  { %584 = vsyncadd [#allocation5], 4294966016 }
  0x31   :  { %585 = dma.done.wait [#allocation8], 1024  }
  0x32   :  { %586 = vsyncadd [#allocation8], 4294966272  ;;  %v593_v0 = vmov 0.0   ;;  %vm594_vm0 = vmmov 0   ;;  %v483_v1 = vld [vmem:[#allocation4 + $0x8] sm:$0xff]   ;;  %v484_v2 = vld [vmem:[#allocation4] sm:$0xff]  }
  0x33   :  { %427 = vmatprep.subr.bf16.mxu0 %v593_v0  ;;  %431 = vmatprep.mubr.msk.bf16.mxu0 %vm594_vm0, %v593_v0  ;;  %v80_v3 = vld [vmem:[#allocation2] sm:$0xff]  ;;  %v485_v4 = vld [vmem:[#allocation6 + $0x38] sm:$0xff]   ;;  %v486_v6 = vld [vmem:[#allocation6 + $0x30] sm:$0xff]   ;;  %vm105_vm1 = vcmask 261120  }
  0x34   :  { %435 = vmatprep.subr.bf16.mxu1 %v593_v0  ;;  %451 = vmatprep.mubr.msk.bf16.mxu1 %vm594_vm0, %v593_v0  ;;  %v81_v5 = vpack.c.bf16 %v80_v3, %v80_v3  ;;  %v487_v7 = vld [vmem:[#allocation6 + $0x28] sm:$0xff]   ;;  %v488_v8 = vld [vmem:[#allocation6 + $0x20] sm:$0xff]   ;;  %v489_v9 = vld [vmem:[#allocation6 + $0x18] sm:$0xff]  }
  0x35   :  { %428 = vmatpush3.bf16.msra.mxu0 %v483_v1  ;;  %436 = vmatpush3.bf16.msra.mxu1 %v485_v4  ;;  %v490_v10 = vld [vmem:[#allocation6 + $0x10] sm:$0xff]   ;;  %v491_v11 = vld [vmem:[#allocation6 + $0x8] sm:$0xff]   ;;  %v492_v12 = vld [vmem:[#allocation6] sm:$0xff]  }
  0x36   :  { %429 = vmatprep.subr.bf16.mxu0 %v593_v0  ;;  %437 = vmatprep.subr.bf16.mxu1 %v593_v0  ;;  %v493_v13 = vld [vmem:[#allocation7 + $0x38] sm:$0xff]   ;;  %v494_v14 = vld [vmem:[#allocation7 + $0x30] sm:$0xff]   ;;  %v495_v15 = vld [vmem:[#allocation7 + $0x28] sm:$0xff]  }
  0x37   :  { %v496_v16 = vld [vmem:[#allocation7 + $0x20] sm:$0xff]   ;;  %v497_v17 = vld [vmem:[#allocation7 + $0x18] sm:$0xff]   ;;  %v498_v18 = vld [vmem:[#allocation7 + $0x10] sm:$0xff]  }
  0x38   :  { %v384_v19 = vld [vmem:[%s694_s2] ss:$0 sm:$0xff]  ;;  %v500_v28 = vld [vmem:[#allocation7] sm:$0xff]  }
  0x39   :  { %430 = vmatpush3.bf16.msra.mxu0 %v484_v2  ;;  %438 = vmatpush3.bf16.msra.mxu1 %v486_v6  ;;  %v499_v27 = vld [vmem:[#allocation7 + $0x8] sm:$0xff]  }
  0x3a   :  { %455 = vmatprep.subr.bf16.mxu0 %v593_v0  ;;  %439 = vmatprep.subr.bf16.mxu1 %v593_v0  ;;  %v388_v29 = vld [vmem:[%s696_s4] ss:$0 sm:$0xff] }
  0x3b   :  { %v397_v37 = vld [vmem:[%s698_s6] ss:$0 sm:$0xff] }
  0x3c   :  { %432 = vmatmul.mubr.msk.bf16.vlgmr.msra.gmra.mxu0 %vm105_vm1, %v81_v5 }
  0x3d   :  { %471 = vmatprep.mubr.msk.bf16.mxu0 %vm594_vm0, %v593_v0  ;;  %440 = vmatpush3.bf16.msra.mxu1 %v487_v7 }
  0x3e   :  { %441 = vmatprep.subr.bf16.mxu1 %v593_v0  ;;  %456 = vmatpush3.bf16.msra.mxu0 %v493_v13 }
  0x3f   :  { %457 = vmatprep.subr.bf16.mxu0 %v593_v0 }
  0x41   :  { %442 = vmatpush3.bf16.msra.mxu1 %v488_v8 }
  0x42   :  { %443 = vmatprep.subr.bf16.mxu1 %v593_v0  ;;  %458 = vmatpush3.bf16.msra.mxu0 %v494_v14 }
  0x43   :  { %459 = vmatprep.subr.bf16.mxu0 %v593_v0 }
  0x45   :  { %444 = vmatpush3.bf16.msra.mxu1 %v489_v9 }
  0x46   :  { %445 = vmatprep.subr.bf16.mxu1 %v593_v0  ;;  %460 = vmatpush3.bf16.msra.mxu0 %v495_v15 }
  0x47   :  { %461 = vmatprep.subr.bf16.mxu0 %v593_v0 }
  0x49   :  { %446 = vmatpush3.bf16.msra.mxu1 %v490_v10 }
  0x4a   :  { %447 = vmatprep.subr.bf16.mxu1 %v593_v0  ;;  %462 = vmatpush3.bf16.msra.mxu0 %v496_v16 }
  0x4b   :  { %463 = vmatprep.subr.bf16.mxu0 %v593_v0 }
  0x4d   :  { %448 = vmatpush3.bf16.msra.mxu1 %v491_v11 }
  0x4e   :  { %449 = vmatprep.subr.bf16.mxu1 %v593_v0  ;;  %464 = vmatpush3.bf16.msra.mxu0 %v497_v17 }
  0x4f   :  { %465 = vmatprep.subr.bf16.mxu0 %v593_v0 }
  0x51   :  { %450 = vmatpush3.bf16.msra.mxu1 %v492_v12 }
  0x52   :  { %466 = vmatpush3.bf16.msra.mxu0 %v498_v18 }
  0x53   :  { %467 = vmatprep.subr.bf16.mxu0 %v593_v0 }
  0x56   :  { %468 = vmatpush3.bf16.msra.mxu0 %v499_v27 }
  0x57   :  { %469 = vmatprep.subr.bf16.mxu0 %v593_v0 }
  0x5a   :  { %470 = vmatpush3.bf16.msra.mxu0 %v500_v28 }
  0xfc   :  { %v143_v20 = vpop.f32.mrf.mxu0 }
  0xfd   :  { %v144_v21 = vadd.f32 %v384_v19, %v143_v20 }
  0xfe   :  { %v433_v22 = vpop.f32.mrf.mxu0 }
  0xff   :  { %v149_v23 = vmax.f32 %v144_v21, 0.0 }
 0x100   :  { %v146_v24 = vpop.f32.mrf.mxu0 }
 0x101   :  { %v150_v25 = vpack.c.bf16 %v149_v23, %v149_v23 }
 0x102   :  { %v434_v26 = vpop.f32.mrf.mxu0 }
 0x103   :  { %452 = vmatmul.mubr.bf16.vlgmr.msra.gmra.mxu1 %v150_v25 }
 0x1c3   :  { %v256_v30 = vpop.f32.mrf.mxu1 }
 0x1c4   :  { %v257_v31 = vadd.f32 %v388_v29, %v256_v30 }
 0x1c5   :  { %v453_v32 = vpop.f32.mrf.mxu1 }
 0x1c6   :  { %v262_v33 = vmax.f32 %v257_v31, 0.0 }
 0x1c7   :  { %v259_v34 = vpop.f32.mrf.mxu1 }
 0x1c8   :  { %v263_v35 = vpack.c.bf16 %v262_v33, %v262_v33 }
 0x1c9   :  { %v454_v36 = vpop.f32.mrf.mxu1 }
 0x1ca   :  { %472 = vmatmul.mubr.bf16.vlgmr.msra.gmra.mxu0 %v263_v35 }
 0x28a   :  { %v369_v38 = vpop.f32.mrf.mxu0 }
 0x28b   :  { %v370_v39 = vadd.f32 %v397_v37, %v369_v38 }
 0x28c   :  { %v473_v40 = vpop.f32.mrf.mxu0 }
 0x28d   :  { %v375_v41 = vpack.c.bf16 %v370_v39, %v370_v39 }
 0x28e   :  { %v372_v42 = vpop.f32.mrf.mxu0 }
 0x28f   :  { %376 = vst [vmem:[%s699_s7] sm:$0xf] %v375_v41 }
 0x290   :  { %v474_v43 = vpop.f32.mrf.mxu0 }
 0x291   :  { %381 = vsyncpa [#allocation3], 1 }
 0x292   :  { %382 = vsyncpa [#allocation5], 1 }
 0x293   :  { %383 = vsyncpa [#allocation8], 1 }

</bundles_post_ra>
